<compile_context>
chip_gen: v5e
topology: v5e:2x2
jax: 0.10.0
libtpu: 0.0.40
codegen_flags: <defaults>
</compile_context>

<pallas_src>
import functools

import numpy as np
import jax
import jax.numpy as jnp
from jax.experimental import pallas as pl
from jax.experimental.pallas import tpu as pltpu


# ----------------------------------------------------------------------------
# Standard JPEG tables (same transposed convention as the torch module).
# ----------------------------------------------------------------------------
_Y_BASE = np.array(
    [[16, 11, 10, 16, 24, 40, 51, 61],
     [12, 12, 14, 19, 26, 58, 60, 55],
     [14, 13, 16, 24, 40, 57, 69, 56],
     [14, 17, 22, 29, 51, 87, 80, 62],
     [18, 22, 37, 56, 68, 109, 103, 77],
     [24, 35, 55, 64, 81, 104, 113, 92],
     [49, 64, 78, 87, 103, 121, 120, 101],
     [72, 92, 95, 98, 112, 100, 103, 99]], dtype=np.float64)

_C_BASE = np.full((8, 8), 99.0, dtype=np.float64)
_C_BASE[:4, :4] = np.array([[17, 18, 24, 47],
                            [18, 21, 26, 66],
                            [24, 26, 56, 99],
                            [47, 66, 99, 99]], dtype=np.float64)

# The torch module stores the tables transposed; keep that convention.
_Y_TABLE = _Y_BASE.T
_C_TABLE = _C_BASE.T


def quality_to_factor(quality):
    quality = float(quality)
    if quality < 50:
        quality = 5000.0 / quality
    else:
        quality = 200.0 - quality * 2
    return quality / 100.0


# ----------------------------------------------------------------------------
# Constant matrices for the separable in-layout DCT / iDCT.
#   C[x, u]  = cos((2x+1) u pi / 16)
#   FL[u, x] = 0.5 * alpha_u * C[x, u]   (vertical / left transform)
#   FR[y, v] = 0.5 * alpha_v * C[y, v]   (horizontal / right transform)
#   coef = FL @ (p - 128) @ FR ;  rec = FL.T @ d @ FR.T + 128
# Chroma: vertical 2x pool / nearest upsample folded into the left matrices,
# horizontal 2x pool / nearest upsample folded into the right matrices.
# ----------------------------------------------------------------------------
@functools.lru_cache(maxsize=16)
def _jpeg_constants(factor, th):
    th2 = th // 2
    k = np.arange(8)
    C = np.cos((2.0 * k[:, None] + 1.0) * k[None, :] * np.pi / 16.0)
    alpha = np.array([1.0 / np.sqrt(2.0)] + [1.0] * 7)
    FL = 0.5 * alpha[:, None] * C.T          # (u, x)
    FR = 0.5 * C * alpha[None, :]            # (y, v)

    def bd(m, reps):
        return np.kron(np.eye(reps), m)

    # ---- luma ----
    dry = bd(FR, 16)                          # (128, 128) right DCT
    dly = bd(FL, th // 8)                     # (th, th)    left DCT
    dryi = dry.T                              # right iDCT
    dlyi = dly.T                              # left iDCT

    # ---- chroma: fold 2x vertical pool / nearest upsample into left mats ----
    idx = np.arange(th2)
    P = np.zeros((th2, th))                   # vertical 2x average
    P[idx, 2 * idx] = 0.5
    P[idx, 2 * idx + 1] = 0.5
    U = np.zeros((th, th2))                   # vertical nearest upsample
    U[2 * idx, idx] = 1.0
    U[2 * idx + 1, idx] = 1.0
    dlc = bd(FL, th2 // 8) @ P                # (th2, th)
    dlci = U @ bd(FL.T, th2 // 8)             # (th, th2)

    # ---- chroma: fold 2x horizontal pool / upsample into right mats ----
    # Each 16-lane group of original columns maps to 8 coefficient lanes;
    # the other 8 lanes stay exactly zero through the whole round trip.
    drc = np.zeros((128, 128))
    drci = np.zeros((128, 128))
    for g in range(8):
        for c in range(16):
            for v in range(8):
                drc[16 * g + c, 16 * g + v] = 0.5 * FR[c // 2, v]
                drci[16 * g + v, 16 * g + c] = FR[c // 2, v]

    # ---- quantization planes (period 8/16, tiled to the tile shape) ----
    qy8 = _Y_TABLE * factor                   # indexed [u, v]
    qc8 = _C_TABLE * factor
    qy = np.tile(qy8, (th // 8, 16))          # (th, 128)
    iqy = np.tile(1.0 / qy8, (th // 8, 16))
    qc16 = np.ones((8, 16))
    iqc16 = np.ones((8, 16))
    qc16[:, :8] = qc8
    iqc16[:, :8] = 1.0 / qc8
    qc = np.tile(qc16, (th2 // 8, 8))         # (th2, 128)
    iqc = np.tile(iqc16, (th2 // 8, 8))

    mats = (dry, dryi, dly, dlyi, drc, drci, dlc, dlci, qy, iqy, qc, iqc)
    return tuple(jnp.asarray(m, dtype=jnp.float32) for m in mats)


# ----------------------------------------------------------------------------
# Fused Pallas kernel: block = (1, 3, th, bw), bw = 128 * n_sub.
# ----------------------------------------------------------------------------
def _diffjpeg_kernel(x_ref, dry_ref, dryi_ref, dly_ref, dlyi_ref,
                     drc_ref, drci_ref, dlc_ref, dlci_ref,
                     qy_ref, iqy_ref, qc_ref, iqc_ref, o_ref, *, n_sub):
    f32 = jnp.float32
    # Hoist resident constants out of the unrolled sub-tile loop.
    dry, dryi = dry_ref[...], dryi_ref[...]
    dly, dlyi = dly_ref[...], dlyi_ref[...]
    drc, drci = drc_ref[...], drci_ref[...]
    dlc, dlci = dlc_ref[...], dlci_ref[...]
    qy, iqy = qy_ref[...], iqy_ref[...]
    qc, iqc = qc_ref[...], iqc_ref[...]

    def round_trip(p, left, lefti, right, righti, q_t, iq_t):
        # forward 2-D DCT (scales folded into left/right)
        t = jnp.dot(p, right, preferred_element_type=f32)
        t = jnp.dot(left, t, preferred_element_type=f32)
        # quantize + diff_round + dequantize
        q = t * iq_t
        r = jnp.round(q)
        q = r + (q - r) ** 3
        d = q * q_t
        # inverse 2-D DCT
        t = jnp.dot(d, righti, preferred_element_type=f32)
        return jnp.dot(lefti, t, preferred_element_type=f32)

    def to_unit(v):
        return jnp.minimum(255.0, jnp.maximum(0.0, v)) * (1.0 / 255.0)

    for j in range(n_sub):                    # static unroll over 128-lane tiles
        sl = slice(j * 128, (j + 1) * 128)
        red = x_ref[0, 0, :, sl] * 255.0
        grn = x_ref[0, 1, :, sl] * 255.0
        blu = x_ref[0, 2, :, sl] * 255.0

        # RGB -> YCbCr (the +/-128 shifts of the reference cancel and are
        # folded here; chroma pooling is folded into the chroma matrices).
        y = 0.299 * red + 0.587 * grn + 0.114 * blu - 128.0
        cb = -0.168736 * red - 0.331264 * grn + 0.5 * blu
        cr = 0.5 * red - 0.418688 * grn - 0.081312 * blu

        y_rec = round_trip(y, dly, dlyi, dry, dryi, qy, iqy) + 128.0
        cb_rec = round_trip(cb, dlc, dlci, drc, drci, qc, iqc)
        cr_rec = round_trip(cr, dlc, dlci, drc, drci, qc, iqc)

        # YCbCr -> RGB, clamp, /255 -- direct 128-lane-aligned sliced stores.
        o_ref[0, 0, :, sl] = to_unit(y_rec + 1.402 * cr_rec)
        o_ref[0, 1, :, sl] = to_unit(y_rec - 0.344136 * cb_rec
                                     - 0.714136 * cr_rec)
        o_ref[0, 2, :, sl] = to_unit(y_rec + 1.772 * cb_rec)


# ----------------------------------------------------------------------------
# Host-side wrapper
# ----------------------------------------------------------------------------
def _pick_tile(size, unit, max_units):
    """Largest multiple of `unit` that divides `size`, at most unit*max_units."""
    m = size // unit
    d = 1
    for cand in range(1, max_units + 1):
        if m % cand == 0:
            d = cand
    return unit * d


def diff_jpeg(x, quality):
    """Differentiable JPEG round trip.  x: (B, 3, H, W) float in [0, 1]."""
    factor = quality_to_factor(quality)
    # quality == 100 makes the quant table zero (NaN in the torch reference
    # too); clamp so it degrades to (near) lossless instead.
    factor = max(float(factor), 1e-6)

    b, ch, h, w = x.shape
    assert ch == 3
    # H to a multiple of 16 (as the torch reference); W to a multiple of 128
    # so every block is lane-dense.  The extra zero columns start on a 16
    # boundary, so valid blocks are bit-identical to the reference's 16-pad.
    h_pad = (-h) % 16
    w_pad = (-w) % 128
    xp = x.astype(jnp.float32)
    if h_pad or w_pad:
        xp = jnp.pad(xp, ((0, 0), (0, 0), (0, h_pad), (0, w_pad)))
    H, W = h + h_pad, w + w_pad

    th = _pick_tile(H, 16, 8)         # rows per block,  16..128
    bw = _pick_tile(W, 128, 4)        # lanes per block, 128..512
    th2 = th // 2
    n_sub = bw // 128
    consts = _jpeg_constants(factor, th)

    const_specs = [pl.BlockSpec(c.shape, lambda bi, i, j: (0, 0))
                   for c in consts]

    # Advisory cost for XLA's scheduler.
    n_tiles = b * (H // th) * (W // 128)
    y_flops = 4 * th * 128 * 128 + 4 * th * th * 128
    c_flops = 2 * (th * 128 * 128 + th2 * th * 128
                   + th2 * 128 * 128 + th * th2 * 128)
    cost = pl.CostEstimate(
        flops=int(n_tiles * (y_flops + 2 * c_flops)),
        transcendentals=0,
        bytes_accessed=int(b * 3 * H * W * 4 * 2
                           + sum(int(np.prod(c.shape)) * 4 for c in consts)))

    out = pl.pallas_call(
        functools.partial(_diffjpeg_kernel, n_sub=n_sub),
        out_shape=jax.ShapeDtypeStruct((b, 3, H, W), jnp.float32),
        grid=(b, H // th, W // bw),
        in_specs=[pl.BlockSpec((1, 3, th, bw),
                               lambda bi, i, j: (bi, 0, i, j))] + const_specs,
        out_specs=pl.BlockSpec((1, 3, th, bw),
                               lambda bi, i, j: (bi, 0, i, j)),
        compiler_params=pltpu.CompilerParams(
            dimension_semantics=("parallel", "parallel", "parallel"),
            vmem_limit_bytes=32 * 1024 * 1024),
        cost_estimate=cost,
    )(xp, *consts)

    if h_pad or w_pad:
        out = out[:, :, :h, :w]
    return out


# ----------------------------------------------------------------------------
# Pure-numpy float64 reference (mirrors the torch module) for self-checking.
# ----------------------------------------------------------------------------
def _reference_diffjpeg(x, quality):
    x = np.asarray(x, dtype=np.float64)
    factor = quality_to_factor(quality)
    bsz, _, h, w = x.shape
    hp, wp = (-h) % 16, (-w) % 16
    img = np.pad(x, ((0, 0), (0, 0), (0, hp), (0, wp))) * 255.0
    H, W = h + hp, w + wp
    r, g, bl = img[:, 0], img[:, 1], img[:, 2]
    y = 0.299 * r + 0.587 * g + 0.114 * bl
    cb = -0.168736 * r - 0.331264 * g + 0.5 * bl + 128.0
    cr = 0.5 * r - 0.418688 * g - 0.081312 * bl + 128.0

    def pool(c):
        return c.reshape(bsz, H // 2, 2, W // 2, 2).mean(axis=(2, 4))

    k = np.arange(8)
    C = np.cos((2.0 * k[:, None] + 1.0) * k[None, :] * np.pi / 16.0)
    alpha = np.array([1.0 / np.sqrt(2.0)] + [1.0] * 7)
    A = np.outer(alpha, alpha)

    def round_trip(plane, table):
        hh, ww = plane.shape[1:]
        blk = plane.reshape(bsz, hh // 8, 8, ww // 8, 8).transpose(0, 1, 3, 2, 4)
        coef = 0.25 * A * np.einsum('...xy,xu,yv->...uv', blk - 128.0, C, C)
        q = coef / table
        rq = np.round(q)
        q = rq + (q - rq) ** 3
        deq = q * table
        rec = 0.25 * np.einsum('...uv,xu,yv->...xy', deq * A, C, C) + 128.0
        return rec.transpose(0, 1, 3, 2, 4).reshape(bsz, hh, ww)

    y_r = round_trip(y, _Y_TABLE * factor)
    cb_r = round_trip(pool(cb), _C_TABLE * factor)
    cr_r = round_trip(pool(cr), _C_TABLE * factor)

    def up(c):
        return np.repeat(np.repeat(c, 2, axis=1), 2, axis=2)

    cbu, cru = up(cb_r) - 128.0, up(cr_r) - 128.0
    rr = y_r + 1.402 * cru
    gg = y_r - 0.344136 * cbu - 0.714136 * cru
    bb = y_r + 1.772 * cbu
    out = np.stack([rr, gg, bb], axis=1)
    out = np.clip(out, 0.0, 255.0) / 255.0
    return out[:, :, :h, :w]


if __name__ == "__main__":
    key = jax.random.PRNGKey(0)
    x = jax.random.uniform(key, (2, 3, 16, 16), dtype=jnp.float32)
    fn = jax.jit(diff_jpeg, static_argnums=1)
    out = jax.block_until_ready(fn(x, 75.0))
    assert out.shape == (2, 3, 16, 16)
    assert out.dtype == jnp.float32
    out_np = np.asarray(out)
    assert np.all(np.isfinite(out_np))
    assert np.all((out_np >= -1e-5) & (out_np <= 1.0 + 1e-5))
    ref = _reference_diffjpeg(np.asarray(x), 75.0)
    err = np.abs(out_np - ref)
    # Loose thresholds: only catastrophic math bugs fail; benign f32-vs-f64
    # diff_round boundary flips stay well inside.
    assert float(err.mean()) < 2e-3, float(err.mean())
    assert float(err.max()) < 0.25, float(err.max())
    print("KERNEL_OK")
</pallas_src>

<mosaic_0001>
module attributes {stable_mosaic.version = 11 : i64} {
  func.func @_diffjpeg_kernel(%arg0: i32, %arg1: i32, %arg2: i32, %arg3: memref<1x3x16x128xf32, #tpu.memory_space<vmem>>, %arg4: memref<128x128xf32, #tpu.memory_space<vmem>>, %arg5: memref<128x128xf32, #tpu.memory_space<vmem>>, %arg6: memref<16x16xf32, #tpu.memory_space<vmem>>, %arg7: memref<16x16xf32, #tpu.memory_space<vmem>>, %arg8: memref<128x128xf32, #tpu.memory_space<vmem>>, %arg9: memref<128x128xf32, #tpu.memory_space<vmem>>, %arg10: memref<8x16xf32, #tpu.memory_space<vmem>>, %arg11: memref<16x8xf32, #tpu.memory_space<vmem>>, %arg12: memref<16x128xf32, #tpu.memory_space<vmem>>, %arg13: memref<16x128xf32, #tpu.memory_space<vmem>>, %arg14: memref<8x128xf32, #tpu.memory_space<vmem>>, %arg15: memref<8x128xf32, #tpu.memory_space<vmem>>, %arg16: memref<1x3x16x128xf32, #tpu.memory_space<vmem>>) attributes {dimension_semantics = [#tpu.dimension_semantics<parallel>, #tpu.dimension_semantics<parallel>, #tpu.dimension_semantics<parallel>], iteration_bounds = array<i64: 2, 1, 1>, scalar_prefetch = 0 : i64, scratch_operands = 0 : i64, tpu.core_type = #tpu.core_type<tc>, window_params = [{transform_indices = @transform_0, window_bounds = array<i64: 1, 3, 16, 128>}, {pipeline_mode = #tpu.pipeline_mode<synchronous>, transform_indices = @transform_1, window_bounds = array<i64: 128, 128>}, {pipeline_mode = #tpu.pipeline_mode<synchronous>, transform_indices = @transform_2, window_bounds = array<i64: 128, 128>}, {pipeline_mode = #tpu.pipeline_mode<synchronous>, transform_indices = @transform_3, window_bounds = array<i64: 16, 16>}, {pipeline_mode = #tpu.pipeline_mode<synchronous>, transform_indices = @transform_4, window_bounds = array<i64: 16, 16>}, {pipeline_mode = #tpu.pipeline_mode<synchronous>, transform_indices = @transform_5, window_bounds = array<i64: 128, 128>}, {pipeline_mode = #tpu.pipeline_mode<synchronous>, transform_indices = @transform_6, window_bounds = array<i64: 128, 128>}, {pipeline_mode = #tpu.pipeline_mode<synchronous>, transform_indices = @transform_7, window_bounds = array<i64: 8, 16>}, {pipeline_mode = #tpu.pipeline_mode<synchronous>, transform_indices = @transform_8, window_bounds = array<i64: 16, 8>}, {pipeline_mode = #tpu.pipeline_mode<synchronous>, transform_indices = @transform_9, window_bounds = array<i64: 16, 128>}, {pipeline_mode = #tpu.pipeline_mode<synchronous>, transform_indices = @transform_10, window_bounds = array<i64: 16, 128>}, {pipeline_mode = #tpu.pipeline_mode<synchronous>, transform_indices = @transform_11, window_bounds = array<i64: 8, 128>}, {pipeline_mode = #tpu.pipeline_mode<synchronous>, transform_indices = @transform_12, window_bounds = array<i64: 8, 128>}, {transform_indices = @transform_13, window_bounds = array<i64: 1, 3, 16, 128>}]} {
    %c0 = arith.constant 0 : index
    %c0_0 = arith.constant 0 : index
    %0 = vector.load %arg4[%c0, %c0_0] : memref<128x128xf32, #tpu.memory_space<vmem>>, vector<128x128xf32>
    %c0_1 = arith.constant 0 : index
    %c0_2 = arith.constant 0 : index
    %1 = vector.load %arg5[%c0_1, %c0_2] : memref<128x128xf32, #tpu.memory_space<vmem>>, vector<128x128xf32>
    %c0_3 = arith.constant 0 : index
    %c0_4 = arith.constant 0 : index
    %2 = vector.load %arg6[%c0_3, %c0_4] : memref<16x16xf32, #tpu.memory_space<vmem>>, vector<16x16xf32>
    %c0_5 = arith.constant 0 : index
    %c0_6 = arith.constant 0 : index
    %3 = vector.load %arg7[%c0_5, %c0_6] : memref<16x16xf32, #tpu.memory_space<vmem>>, vector<16x16xf32>
    %c0_7 = arith.constant 0 : index
    %c0_8 = arith.constant 0 : index
    %4 = vector.load %arg8[%c0_7, %c0_8] : memref<128x128xf32, #tpu.memory_space<vmem>>, vector<128x128xf32>
    %c0_9 = arith.constant 0 : index
    %c0_10 = arith.constant 0 : index
    %5 = vector.load %arg9[%c0_9, %c0_10] : memref<128x128xf32, #tpu.memory_space<vmem>>, vector<128x128xf32>
    %c0_11 = arith.constant 0 : index
    %c0_12 = arith.constant 0 : index
    %6 = vector.load %arg10[%c0_11, %c0_12] : memref<8x16xf32, #tpu.memory_space<vmem>>, vector<8x16xf32>
    %c0_13 = arith.constant 0 : index
    %c0_14 = arith.constant 0 : index
    %7 = vector.load %arg11[%c0_13, %c0_14] : memref<16x8xf32, #tpu.memory_space<vmem>>, vector<16x8xf32>
    %c0_15 = arith.constant 0 : index
    %c0_16 = arith.constant 0 : index
    %8 = vector.load %arg12[%c0_15, %c0_16] : memref<16x128xf32, #tpu.memory_space<vmem>>, vector<16x128xf32>
    %c0_17 = arith.constant 0 : index
    %c0_18 = arith.constant 0 : index
    %9 = vector.load %arg13[%c0_17, %c0_18] : memref<16x128xf32, #tpu.memory_space<vmem>>, vector<16x128xf32>
    %c0_19 = arith.constant 0 : index
    %c0_20 = arith.constant 0 : index
    %10 = vector.load %arg14[%c0_19, %c0_20] : memref<8x128xf32, #tpu.memory_space<vmem>>, vector<8x128xf32>
    %c0_21 = arith.constant 0 : index
    %c0_22 = arith.constant 0 : index
    %11 = vector.load %arg15[%c0_21, %c0_22] : memref<8x128xf32, #tpu.memory_space<vmem>>, vector<8x128xf32>
    %c0_23 = arith.constant 0 : index
    %c0_24 = arith.constant 0 : index
    %c0_25 = arith.constant 0 : index
    %c0_26 = arith.constant 0 : index
    %12 = vector.load %arg3[%c0_23, %c0_24, %c0_25, %c0_26] : memref<1x3x16x128xf32, #tpu.memory_space<vmem>>, vector<1x1x16x128xf32>
    %13 = vector.shape_cast %12 : vector<1x1x16x128xf32> to vector<16x128xf32>
    %cst = arith.constant 2.550000e+02 : f32
    %14 = vector.broadcast %cst : f32 to vector<16x128xf32>
    %15 = arith.mulf %13, %14 : vector<16x128xf32>
    %c0_27 = arith.constant 0 : index
    %c1 = arith.constant 1 : index
    %c0_28 = arith.constant 0 : index
    %c0_29 = arith.constant 0 : index
    %16 = vector.load %arg3[%c0_27, %c1, %c0_28, %c0_29] : memref<1x3x16x128xf32, #tpu.memory_space<vmem>>, vector<1x1x16x128xf32>
    %17 = vector.shape_cast %16 : vector<1x1x16x128xf32> to vector<16x128xf32>
    %cst_30 = arith.constant 2.550000e+02 : f32
    %18 = vector.broadcast %cst_30 : f32 to vector<16x128xf32>
    %19 = arith.mulf %17, %18 : vector<16x128xf32>
    %c0_31 = arith.constant 0 : index
    %c2 = arith.constant 2 : index
    %c0_32 = arith.constant 0 : index
    %c0_33 = arith.constant 0 : index
    %20 = vector.load %arg3[%c0_31, %c2, %c0_32, %c0_33] : memref<1x3x16x128xf32, #tpu.memory_space<vmem>>, vector<1x1x16x128xf32>
    %21 = vector.shape_cast %20 : vector<1x1x16x128xf32> to vector<16x128xf32>
    %cst_34 = arith.constant 2.550000e+02 : f32
    %22 = vector.broadcast %cst_34 : f32 to vector<16x128xf32>
    %23 = arith.mulf %21, %22 : vector<16x128xf32>
    %cst_35 = arith.constant 2.990000e-01 : f32
    %24 = vector.broadcast %cst_35 : f32 to vector<16x128xf32>
    %25 = arith.mulf %24, %15 : vector<16x128xf32>
    %cst_36 = arith.constant 5.870000e-01 : f32
    %26 = vector.broadcast %cst_36 : f32 to vector<16x128xf32>
    %27 = arith.mulf %26, %19 : vector<16x128xf32>
    %28 = arith.addf %25, %27 : vector<16x128xf32>
    %cst_37 = arith.constant 1.140000e-01 : f32
    %29 = vector.broadcast %cst_37 : f32 to vector<16x128xf32>
    %30 = arith.mulf %29, %23 : vector<16x128xf32>
    %31 = arith.addf %28, %30 : vector<16x128xf32>
    %cst_38 = arith.constant 1.280000e+02 : f32
    %32 = vector.broadcast %cst_38 : f32 to vector<16x128xf32>
    %33 = arith.subf %31, %32 : vector<16x128xf32>
    %cst_39 = arith.constant -1.687360e-01 : f32
    %34 = vector.broadcast %cst_39 : f32 to vector<16x128xf32>
    %35 = arith.mulf %34, %15 : vector<16x128xf32>
    %cst_40 = arith.constant 3.312640e-01 : f32
    %36 = vector.broadcast %cst_40 : f32 to vector<16x128xf32>
    %37 = arith.mulf %36, %19 : vector<16x128xf32>
    %38 = arith.subf %35, %37 : vector<16x128xf32>
    %cst_41 = arith.constant 5.000000e-01 : f32
    %39 = vector.broadcast %cst_41 : f32 to vector<16x128xf32>
    %40 = arith.mulf %39, %23 : vector<16x128xf32>
    %41 = arith.addf %38, %40 : vector<16x128xf32>
    %cst_42 = arith.constant 5.000000e-01 : f32
    %42 = vector.broadcast %cst_42 : f32 to vector<16x128xf32>
    %43 = arith.mulf %42, %15 : vector<16x128xf32>
    %cst_43 = arith.constant 4.186880e-01 : f32
    %44 = vector.broadcast %cst_43 : f32 to vector<16x128xf32>
    %45 = arith.mulf %44, %19 : vector<16x128xf32>
    %46 = arith.subf %43, %45 : vector<16x128xf32>
    %cst_44 = arith.constant 8.131200e-02 : f32
    %47 = vector.broadcast %cst_44 : f32 to vector<16x128xf32>
    %48 = arith.mulf %47, %23 : vector<16x128xf32>
    %49 = arith.subf %46, %48 : vector<16x128xf32>
    %cst_45 = arith.constant dense<0.000000e+00> : vector<16x128xf32>
    %50 = tpu.matmul %33, %0, %cst_45 {dimension_numbers = #tpu.dot_dimension_numbers<[1], [0], [0], [1], [0, 0, 1, 1], [], []>} : vector<16x128xf32>, vector<128x128xf32>, vector<16x128xf32> -> vector<16x128xf32>
    %cst_46 = arith.constant dense<0.000000e+00> : vector<16x128xf32>
    %51 = tpu.matmul %2, %50, %cst_46 {dimension_numbers = #tpu.dot_dimension_numbers<[1], [0], [0], [1], [0, 0, 1, 1], [], []>} : vector<16x16xf32>, vector<16x128xf32>, vector<16x128xf32> -> vector<16x128xf32>
    %52 = arith.mulf %51, %9 : vector<16x128xf32>
    %53 = math.roundeven %52 : vector<16x128xf32>
    %54 = arith.subf %52, %53 : vector<16x128xf32>
    %55 = arith.mulf %54, %54 : vector<16x128xf32>
    %56 = arith.mulf %54, %55 : vector<16x128xf32>
    %57 = arith.addf %53, %56 : vector<16x128xf32>
    %58 = arith.mulf %57, %8 : vector<16x128xf32>
    %cst_47 = arith.constant dense<0.000000e+00> : vector<16x128xf32>
    %59 = tpu.matmul %58, %1, %cst_47 {dimension_numbers = #tpu.dot_dimension_numbers<[1], [0], [0], [1], [0, 0, 1, 1], [], []>} : vector<16x128xf32>, vector<128x128xf32>, vector<16x128xf32> -> vector<16x128xf32>
    %cst_48 = arith.constant dense<0.000000e+00> : vector<16x128xf32>
    %60 = tpu.matmul %3, %59, %cst_48 {dimension_numbers = #tpu.dot_dimension_numbers<[1], [0], [0], [1], [0, 0, 1, 1], [], []>} : vector<16x16xf32>, vector<16x128xf32>, vector<16x128xf32> -> vector<16x128xf32>
    %cst_49 = arith.constant 1.280000e+02 : f32
    %61 = vector.broadcast %cst_49 : f32 to vector<16x128xf32>
    %62 = arith.addf %60, %61 : vector<16x128xf32>
    %cst_50 = arith.constant dense<0.000000e+00> : vector<16x128xf32>
    %63 = tpu.matmul %41, %4, %cst_50 {dimension_numbers = #tpu.dot_dimension_numbers<[1], [0], [0], [1], [0, 0, 1, 1], [], []>} : vector<16x128xf32>, vector<128x128xf32>, vector<16x128xf32> -> vector<16x128xf32>
    %cst_51 = arith.constant dense<0.000000e+00> : vector<8x128xf32>
    %64 = tpu.matmul %6, %63, %cst_51 {dimension_numbers = #tpu.dot_dimension_numbers<[1], [0], [0], [1], [0, 0, 1, 1], [], []>} : vector<8x16xf32>, vector<16x128xf32>, vector<8x128xf32> -> vector<8x128xf32>
    %65 = arith.mulf %64, %11 : vector<8x128xf32>
    %66 = math.roundeven %65 : vector<8x128xf32>
    %67 = arith.subf %65, %66 : vector<8x128xf32>
    %68 = arith.mulf %67, %67 : vector<8x128xf32>
    %69 = arith.mulf %67, %68 : vector<8x128xf32>
    %70 = arith.addf %66, %69 : vector<8x128xf32>
    %71 = arith.mulf %70, %10 : vector<8x128xf32>
    %cst_52 = arith.constant dense<0.000000e+00> : vector<8x128xf32>
    %72 = tpu.matmul %71, %5, %cst_52 {dimension_numbers = #tpu.dot_dimension_numbers<[1], [0], [0], [1], [0, 0, 1, 1], [], []>} : vector<8x128xf32>, vector<128x128xf32>, vector<8x128xf32> -> vector<8x128xf32>
    %cst_53 = arith.constant dense<0.000000e+00> : vector<16x128xf32>
    %73 = tpu.matmul %7, %72, %cst_53 {dimension_numbers = #tpu.dot_dimension_numbers<[1], [0], [0], [1], [0, 0, 1, 1], [], []>} : vector<16x8xf32>, vector<8x128xf32>, vector<16x128xf32> -> vector<16x128xf32>
    %cst_54 = arith.constant dense<0.000000e+00> : vector<16x128xf32>
    %74 = tpu.matmul %49, %4, %cst_54 {dimension_numbers = #tpu.dot_dimension_numbers<[1], [0], [0], [1], [0, 0, 1, 1], [], []>} : vector<16x128xf32>, vector<128x128xf32>, vector<16x128xf32> -> vector<16x128xf32>
    %cst_55 = arith.constant dense<0.000000e+00> : vector<8x128xf32>
    %75 = tpu.matmul %6, %74, %cst_55 {dimension_numbers = #tpu.dot_dimension_numbers<[1], [0], [0], [1], [0, 0, 1, 1], [], []>} : vector<8x16xf32>, vector<16x128xf32>, vector<8x128xf32> -> vector<8x128xf32>
    %76 = arith.mulf %75, %11 : vector<8x128xf32>
    %77 = math.roundeven %76 : vector<8x128xf32>
    %78 = arith.subf %76, %77 : vector<8x128xf32>
    %79 = arith.mulf %78, %78 : vector<8x128xf32>
    %80 = arith.mulf %78, %79 : vector<8x128xf32>
    %81 = arith.addf %77, %80 : vector<8x128xf32>
    %82 = arith.mulf %81, %10 : vector<8x128xf32>
    %cst_56 = arith.constant dense<0.000000e+00> : vector<8x128xf32>
    %83 = tpu.matmul %82, %5, %cst_56 {dimension_numbers = #tpu.dot_dimension_numbers<[1], [0], [0], [1], [0, 0, 1, 1], [], []>} : vector<8x128xf32>, vector<128x128xf32>, vector<8x128xf32> -> vector<8x128xf32>
    %cst_57 = arith.constant dense<0.000000e+00> : vector<16x128xf32>
    %84 = tpu.matmul %7, %83, %cst_57 {dimension_numbers = #tpu.dot_dimension_numbers<[1], [0], [0], [1], [0, 0, 1, 1], [], []>} : vector<16x8xf32>, vector<8x128xf32>, vector<16x128xf32> -> vector<16x128xf32>
    %cst_58 = arith.constant 1.402000e+00 : f32
    %85 = vector.broadcast %cst_58 : f32 to vector<16x128xf32>
    %86 = arith.mulf %85, %84 : vector<16x128xf32>
    %87 = arith.addf %62, %86 : vector<16x128xf32>
    %cst_59 = arith.constant 0.000000e+00 : f32
    %88 = vector.broadcast %cst_59 : f32 to vector<16x128xf32>
    %89 = arith.maximumf %88, %87 : vector<16x128xf32>
    %cst_60 = arith.constant 2.550000e+02 : f32
    %90 = vector.broadcast %cst_60 : f32 to vector<16x128xf32>
    %91 = arith.minimumf %90, %89 : vector<16x128xf32>
    %cst_61 = arith.constant 0.00392156886 : f32
    %92 = vector.broadcast %cst_61 : f32 to vector<16x128xf32>
    %93 = arith.mulf %91, %92 : vector<16x128xf32>
    %c0_62 = arith.constant 0 : index
    %c0_63 = arith.constant 0 : index
    %c0_64 = arith.constant 0 : index
    %c0_65 = arith.constant 0 : index
    %94 = vector.load %arg16[%c0_62, %c0_63, %c0_64, %c0_65] : memref<1x3x16x128xf32, #tpu.memory_space<vmem>>, vector<1x1x16x128xf32>
    %95 = vector.shape_cast %94 : vector<1x1x16x128xf32> to vector<16x128xf32>
    %96 = vector.shape_cast %93 : vector<16x128xf32> to vector<1x1x16x128xf32>
    tpu.vector_store %arg16[%c0_62, %c0_63, %c0_64, %c0_65], %96 {strides = array<i32>} : memref<1x3x16x128xf32, #tpu.memory_space<vmem>>, vector<1x1x16x128xf32>,
    %cst_66 = arith.constant 3.441360e-01 : f32
    %97 = vector.broadcast %cst_66 : f32 to vector<16x128xf32>
    %98 = arith.mulf %97, %73 : vector<16x128xf32>
    %99 = arith.subf %62, %98 : vector<16x128xf32>
    %cst_67 = arith.constant 7.141360e-01 : f32
    %100 = vector.broadcast %cst_67 : f32 to vector<16x128xf32>
    %101 = arith.mulf %100, %84 : vector<16x128xf32>
    %102 = arith.subf %99, %101 : vector<16x128xf32>
    %cst_68 = arith.constant 0.000000e+00 : f32
    %103 = vector.broadcast %cst_68 : f32 to vector<16x128xf32>
    %104 = arith.maximumf %103, %102 : vector<16x128xf32>
    %cst_69 = arith.constant 2.550000e+02 : f32
    %105 = vector.broadcast %cst_69 : f32 to vector<16x128xf32>
    %106 = arith.minimumf %105, %104 : vector<16x128xf32>
    %cst_70 = arith.constant 0.00392156886 : f32
    %107 = vector.broadcast %cst_70 : f32 to vector<16x128xf32>
    %108 = arith.mulf %106, %107 : vector<16x128xf32>
    %c0_71 = arith.constant 0 : index
    %c1_72 = arith.constant 1 : index
    %c0_73 = arith.constant 0 : index
    %c0_74 = arith.constant 0 : index
    %109 = vector.load %arg16[%c0_71, %c1_72, %c0_73, %c0_74] : memref<1x3x16x128xf32, #tpu.memory_space<vmem>>, vector<1x1x16x128xf32>
    %110 = vector.shape_cast %109 : vector<1x1x16x128xf32> to vector<16x128xf32>
    %111 = vector.shape_cast %108 : vector<16x128xf32> to vector<1x1x16x128xf32>
    tpu.vector_store %arg16[%c0_71, %c1_72, %c0_73, %c0_74], %111 {strides = array<i32>} : memref<1x3x16x128xf32, #tpu.memory_space<vmem>>, vector<1x1x16x128xf32>,
    %cst_75 = arith.constant 1.772000e+00 : f32
    %112 = vector.broadcast %cst_75 : f32 to vector<16x128xf32>
    %113 = arith.mulf %112, %73 : vector<16x128xf32>
    %114 = arith.addf %62, %113 : vector<16x128xf32>
    %cst_76 = arith.constant 0.000000e+00 : f32
    %115 = vector.broadcast %cst_76 : f32 to vector<16x128xf32>
    %116 = arith.maximumf %115, %114 : vector<16x128xf32>
    %cst_77 = arith.constant 2.550000e+02 : f32
    %117 = vector.broadcast %cst_77 : f32 to vector<16x128xf32>
    %118 = arith.minimumf %117, %116 : vector<16x128xf32>
    %cst_78 = arith.constant 0.00392156886 : f32
    %119 = vector.broadcast %cst_78 : f32 to vector<16x128xf32>
    %120 = arith.mulf %118, %119 : vector<16x128xf32>
    %c0_79 = arith.constant 0 : index
    %c2_80 = arith.constant 2 : index
    %c0_81 = arith.constant 0 : index
    %c0_82 = arith.constant 0 : index
    %121 = vector.load %arg16[%c0_79, %c2_80, %c0_81, %c0_82] : memref<1x3x16x128xf32, #tpu.memory_space<vmem>>, vector<1x1x16x128xf32>
    %122 = vector.shape_cast %121 : vector<1x1x16x128xf32> to vector<16x128xf32>
    %123 = vector.shape_cast %120 : vector<16x128xf32> to vector<1x1x16x128xf32>
    tpu.vector_store %arg16[%c0_79, %c2_80, %c0_81, %c0_82], %123 {strides = array<i32>} : memref<1x3x16x128xf32, #tpu.memory_space<vmem>>, vector<1x1x16x128xf32>,
    return
  }
  func.func @transform_0(%arg0: i32, %arg1: i32, %arg2: i32) -> (i32, i32, i32, i32) {
    %c0_i32 = arith.constant 0 : i32
    %c0_i32_0 = arith.constant 0 : i32
    return %arg0, %c0_i32, %arg1, %arg2 : i32, i32, i32, i32
  }
  func.func @transform_1(%arg0: i32, %arg1: i32, %arg2: i32) -> (i32, i32) {
    %c0_i32 = arith.constant 0 : i32
    %c0_i32_0 = arith.constant 0 : i32
    %c0_i32_1 = arith.constant 0 : i32
    return %c0_i32, %c0_i32_0 : i32, i32
  }
  func.func @transform_2(%arg0: i32, %arg1: i32, %arg2: i32) -> (i32, i32) {
    %c0_i32 = arith.constant 0 : i32
    %c0_i32_0 = arith.constant 0 : i32
    %c0_i32_1 = arith.constant 0 : i32
    return %c0_i32, %c0_i32_0 : i32, i32
  }
  func.func @transform_3(%arg0: i32, %arg1: i32, %arg2: i32) -> (i32, i32) {
    %c0_i32 = arith.constant 0 : i32
    %c0_i32_0 = arith.constant 0 : i32
    %c0_i32_1 = arith.constant 0 : i32
    return %c0_i32, %c0_i32_0 : i32, i32
  }
  func.func @transform_4(%arg0: i32, %arg1: i32, %arg2: i32) -> (i32, i32) {
    %c0_i32 = arith.constant 0 : i32
    %c0_i32_0 = arith.constant 0 : i32
    %c0_i32_1 = arith.constant 0 : i32
    return %c0_i32, %c0_i32_0 : i32, i32
  }
  func.func @transform_5(%arg0: i32, %arg1: i32, %arg2: i32) -> (i32, i32) {
    %c0_i32 = arith.constant 0 : i32
    %c0_i32_0 = arith.constant 0 : i32
    %c0_i32_1 = arith.constant 0 : i32
    return %c0_i32, %c0_i32_0 : i32, i32
  }
  func.func @transform_6(%arg0: i32, %arg1: i32, %arg2: i32) -> (i32, i32) {
    %c0_i32 = arith.constant 0 : i32
    %c0_i32_0 = arith.constant 0 : i32
    %c0_i32_1 = arith.constant 0 : i32
    return %c0_i32, %c0_i32_0 : i32, i32
  }
  func.func @transform_7(%arg0: i32, %arg1: i32, %arg2: i32) -> (i32, i32) {
    %c0_i32 = arith.constant 0 : i32
    %c0_i32_0 = arith.constant 0 : i32
    %c0_i32_1 = arith.constant 0 : i32
    return %c0_i32, %c0_i32_0 : i32, i32
  }
  func.func @transform_8(%arg0: i32, %arg1: i32, %arg2: i32) -> (i32, i32) {
    %c0_i32 = arith.constant 0 : i32
    %c0_i32_0 = arith.constant 0 : i32
    %c0_i32_1 = arith.constant 0 : i32
    return %c0_i32, %c0_i32_0 : i32, i32
  }
  func.func @transform_9(%arg0: i32, %arg1: i32, %arg2: i32) -> (i32, i32) {
    %c0_i32 = arith.constant 0 : i32
    %c0_i32_0 = arith.constant 0 : i32
    %c0_i32_1 = arith.constant 0 : i32
    return %c0_i32, %c0_i32_0 : i32, i32
  }
  func.func @transform_10(%arg0: i32, %arg1: i32, %arg2: i32) -> (i32, i32) {
    %c0_i32 = arith.constant 0 : i32
    %c0_i32_0 = arith.constant 0 : i32
    %c0_i32_1 = arith.constant 0 : i32
    return %c0_i32, %c0_i32_0 : i32, i32
  }
  func.func @transform_11(%arg0: i32, %arg1: i32, %arg2: i32) -> (i32, i32) {
    %c0_i32 = arith.constant 0 : i32
    %c0_i32_0 = arith.constant 0 : i32
    %c0_i32_1 = arith.constant 0 : i32
    return %c0_i32, %c0_i32_0 : i32, i32
  }
  func.func @transform_12(%arg0: i32, %arg1: i32, %arg2: i32) -> (i32, i32) {
    %c0_i32 = arith.constant 0 : i32
    %c0_i32_0 = arith.constant 0 : i32
    %c0_i32_1 = arith.constant 0 : i32
    return %c0_i32, %c0_i32_0 : i32, i32
  }
  func.func @transform_13(%arg0: i32, %arg1: i32, %arg2: i32) -> (i32, i32, i32, i32) {
    %c0_i32 = arith.constant 0 : i32
    %c0_i32_0 = arith.constant 0 : i32
    return %arg0, %c0_i32, %arg1, %arg2 : i32, i32, i32, i32
  }
}

</mosaic_0001>

<bundles_post_ra>
// kernel: diff_jpeg.1
= control target key start
LH: loop header
LB: loop body
LE: loop exit
PB: predicated region body
PF: predicated region fallthrough
CT: control target
= control target key end

     0   :  { %s2068_s0 = inlined_call_operand.vmem [shape: f32[2,3,16,128], index: 0, kind: input, shape index: {}]   ;;  %s2069_s1 = inlined_call_operand.hbm [shape: f32[128,128], index: 1, kind: input, shape index: {}]   ;;  %s2070_s2 = inlined_call_operand.hbm [shape: f32[128,128], index: 2, kind: input, shape index: {}]   ;;  %s2071_s3 = inlined_call_operand.hbm [shape: f32[16,16], index: 3, kind: input, shape index: {}]   ;;  %s2072_s4 = inlined_call_operand.vmem [shape: f32[16,16], index: 4, kind: input, shape index: {}]   ;;  %s2073_s5 = inlined_call_operand.hbm [shape: f32[128,128], index: 5, kind: input, shape index: {}]   ;;  %s2074_s6 = inlined_call_operand.vmem [shape: f32[128,128], index: 6, kind: input, shape index: {}]   ;;  %s2075_s7 = inlined_call_operand.hbm [shape: f32[8,16], index: 7, kind: input, shape index: {}]   ;;  %s2076_s8 = inlined_call_operand.vmem [shape: f32[16,8], index: 8, kind: input, shape index: {}]   ;;  %s2077_s9 = inlined_call_operand.vmem [shape: f32[16,128], index: 9, kind: input, shape index: {}]   ;;  %s2078_s10 = inlined_call_operand.vmem [shape: f32[16,128], index: 10, kind: input, shape index: {}]   ;;  %s2079_s11 = inlined_call_operand.hbm [shape: f32[8,128], index: 11, kind: input, shape index: {}]   ;;  %s2080_s12 = inlined_call_operand.vmem [shape: f32[8,128], index: 12, kind: input, shape index: {}]   ;;  %s2081_s13 = inlined_call_operand.hbm [shape: f32[2,3,16,128], index: 13, kind: output, shape index: {}]  }
   0x1   :  { %2092 = sst [smem:[#allocation27_spill]] %s2070_s2 }
   0x2   :  { %2093 = sst [smem:[#allocation28_spill]] %s2073_s5 }
   0x3   :  { %2094 = sst [smem:[#allocation29_spill]] %s2081_s13 }
   0x4   :  { %18 = vsyncpa [#allocation3], 0 }
   0x5   :  { %19 = vsyncpa [#allocation6], 0 }
   0x6   :  { %20 = vsyncpa [#allocation9], 0 }
   0x7   :  { %21 = vsyncpa [#allocation12], 0 }
   0x8   :  { %22 = vsyncpa [#allocation4], 0 }
   0x9   :  { %24 = vsyncpa [#allocation4 + $0x1], 0  ;;  %s1783_s25 = smov 0   ;;  %s1785_s26 = smov 0  }
   0xa   :  { %s1787_s27 = smov 0   ;;  %s1789_s28 = smov 0  }
   0xb   :  { %s1791_s29 = smov 0   ;;  %s1793_s30 = smov 0  }
   0xc LB: > { %2095 = sst [smem:[#allocation19_spill]] %s1681_s25  ;;  %s1231_s14 = sadd.s32 4294967295, %s1701_s30   ;;  %s1701_s30 = sphi %s1793_s30, %s30_s30   ;;  %s1697_s29 = sphi %s1791_s29, %s2118_s29   ;;  %s1693_s28 = sphi %s1789_s28, %s2117_s28   ;;  %s1689_s27 = sphi %s1787_s27, %s2121_s27   ;;  %s1685_s26 = sphi %s1785_s26, %s2120_s26   ;;  %s1681_s25 = sphi %s1783_s25, %s2119_s25  }
   0xd   : > { %2096 = sst [smem:[#allocation20_spill]] %s1689_s27  ;;  %s1232_s15 = sadd.s32 4294967294, %s1701_s30  }
   0xe   : > { %2097 = sst [smem:[#allocation21_spill]] %s1697_s29  ;;  %s49_s16 = sadd.s32 1, %s1697_s29 }
   0xf   : > { %2098 = sst [smem:[#allocation22_spill]] %s1701_s30  ;;  %s342_s17 = sadd.s32 1, %s1689_s27 }
  0x10   : > { %p51_p0 = scmp.ge.s32.totalorder %s49_s16, 2  ;;  %p352_p1 = scmp.ne.s32.totalorder %s1689_s27, %s1685_s26 }
  0x11   : > { %p353_p2 = scmp.eq.s32.totalorder %s1231_s14, 1  ;;  %p358_p3 = scmp.ne.s32.totalorder %s1685_s26, %s1681_s25 }
  0x12   : > { %s2123_s16 = smov (%p51_p0, %s49_s16), 0  ;;  %p359_p5 = scmp.eq.s32.totalorder %s1232_s15, 1 }
  0x13   : > { %2099 = sst [smem:[#allocation23_spill]] %s2123_s16  ;;  %p1823_p4 = por %p353_p2, %p352_p1 }
  0x14   : > { %s335_s19 = ssub.s32 %s1697_s29, %s2123_s16  ;;  %p1233_p6 = scmp.ge.s32.totalorder %s1701_s30, 1 }
  0x15   : > { %s2100_s18 = scalar_select %p1823_p4, 1, 0 }
  0x16   : > { %p340_p7 = scmp.eq.s32.totalorder %s335_s19, 0  ;;  %p1830_p8 = por %p359_p5, %p358_p3 }
  0x17   : > { %2101 = sst [smem:[#allocation24_spill]] %s2100_s18  ;;  %p366_p9 = scmp.lt.s32.totalorder %s1701_s30, 3 }
  0x18   : > { %s2102_s20 = scalar_select %p1830_p8, 1, 0 }
  0x19   : > { %s1836_s21 = scalar_select %p340_p7, %s1689_s27, %s342_s17  }
  0x1a   : > { %2103 = sst [smem:[#allocation25_spill]] %s2102_s20  ;;  %p1838_p10 = pnand %p1233_p6, %p366_p9 }
  0x1b   : > { %2104 = sst [smem:[#allocation26_spill]] %s1836_s21  ;;  %p1842_p11 = scmp.eq.s32.totalorder %s1231_s14, 0 }
  0x1c   : > { %p1333_p12 = pneg %p1838_p10  ;;  %s2107_s2 = sld [smem:[#allocation27_spill]] }
  0x1d   : > { %s1703_s16 = smov [#allocation5]   ;;  %s2109_s5 = sld [smem:[#allocation28_spill]] }
  0x1e   : > { %p1853_p13 = pnand %p1842_p11, %p1333_p12  ;;  %s393_s14 = sshll.u32 %s1703_s16, 4  ;;  %s394_s14 = int_to_ptr.vmem [resolvable:$true] %s393_s14 }
  0x1f   : > { %s1704_s20 = smov 128   ;;  %s1705_s24 = smov 8  }
  0x20   : > { %s1706_s15 = smov [#allocation8]   ;;  %s377_s18 = sshll.u32 %s2069_s1, 4  ;;  %s378_s18 = int_to_ptr.hbm [resolvable:$true] %s377_s18 }
  0x21   : > { %s1707_s16 = smov [#allocation2]   ;;  %s405_s13 = sshll.u32 %s2071_s3, 4  ;;  %s406_s13 = int_to_ptr.hbm [resolvable:$true] %s405_s13 }
  0x22   : > { %s391_s19 = sshll.u32 %s2107_s2, 4  ;;  %s424_s2 = sshll.u32 %s1706_s15, 4  ;;  %s392_s19 = int_to_ptr.hbm [resolvable:$true] %s391_s19  ;;  %s425_s2 = int_to_ptr.vmem [resolvable:$true] %s424_s2 }
  0x23   : > { %s422_s27 = sshll.u32 %s2109_s5, 4  ;;  %s379_s29 = sshll.u32 %s1707_s16, 4  ;;  %s423_s27 = int_to_ptr.hbm [resolvable:$true] %s422_s27  ;;  %s380_s29 = int_to_ptr.vmem [resolvable:$true] %s379_s29 }
  0x24   : > { %1339 = dma.hbm_to_vmem [thread:$0]  (!%p1853_p13), %s392_s19, 2048, %s394_s14, [#allocation6], %s1704_s20, %s1704_s20, %s1705_s24  }
  0x25   : > { %1345 = dma.hbm_to_vmem [thread:$0]  (!%p1853_p13), %s423_s27, 2048, %s425_s2, [#allocation9], %s1704_s20, %s1704_s20, %s1705_s24  }
  0x26   : > { %1336 = dma.hbm_to_vmem [thread:$0]  (!%p1853_p13), %s378_s18, 2048, %s380_s29, [#allocation3], %s1704_s20, %s1704_s20, %s1705_s24  }
  0x27   : > { %s440_s25 = sshll.u32 %s2075_s7, 4  ;;  %s1708_s30 = smov [#allocation7]   ;;  %s441_s25 = int_to_ptr.hbm [resolvable:$true] %s440_s25 }
  0x28   : > { %s407_s15 = sshll.u32 %s1708_s30, 4  ;;  %s1709_s2 = smov [#allocation10]   ;;  %s408_s15 = int_to_ptr.vmem [resolvable:$true] %s407_s15 }
  0x29   : > { %1342 = dma.hbm_to_vmem [thread:$0]  (!%p1853_p13), %s406_s13, 256, %s408_s15, [#allocation6], %s1704_s20, %s1704_s20, %s1705_s24  }
  0x2a   : > { %s442_s27 = sshll.u32 %s1709_s2, 4  ;;  %s461_s21 = sshll.u32 %s2079_s11, 4  ;;  %s443_s27 = int_to_ptr.vmem [resolvable:$true] %s442_s27  ;;  %s462_s21 = int_to_ptr.hbm [resolvable:$true] %s461_s21 }
  0x2b   : > { %1348 = dma.hbm_to_vmem [thread:$0]  (!%p1853_p13), %s441_s25, 128, %s443_s27, [#allocation9]  }
  0x2c   : > { %s1710_s18 = smov [#allocation11]   ;;  %495 = sbr.rel (%p1838_p10) target bundleno = 973 (0x3cd), region = 72 }
  0x2d   : > { %s463_s29 = sshll.u32 %s1710_s18, 4  ;;  %s464_s29 = int_to_ptr.vmem [resolvable:$true] %s463_s29 }
  0x2e   : > { %1351 = dma.hbm_to_vmem [thread:$0]  (!%p1853_p13), %s462_s21, 128, %s464_s29, [#allocation12]  }
  0x31   : > { %1660 = dma.done.wait (%p1842_p11), [#allocation3], 2048  }
  0x32   : > { %1662 = vsyncadd (%p1842_p11), [#allocation3], 4294965248 }
  0x33   : > { %1664 = dma.done.wait (%p1842_p11), [#allocation6], 2304  }
  0x34   : > { %1666 = vsyncadd (%p1842_p11), [#allocation6], 4294964992 }
  0x35   : > { %1668 = dma.done.wait (%p1842_p11), [#allocation9], 2176  }
  0x36   : > { %1670 = vsyncadd (%p1842_p11), [#allocation9], 4294965120 }
  0x37   : > { %1672 = dma.done.wait (%p1842_p11), [#allocation12], 128  }
  0x38   : > { %1674 = vsyncadd (%p1842_p11), [#allocation12], 4294967168  ;;  %p573_p0 = scmp.lt.s32.totalorder %s1693_s28, 1  ;;  %v601_v0 = vld [vmem:[#allocation2 + $0x78] sm:$0xff]  ;;  %v600_v1 = vld [vmem:[#allocation2 + $0x70] sm:$0xff]  ;;  %vm732_vm0 = vcmask 130048  }
  0x39   : > { %709 = vmatpush.msra.mxu0 %v601_v0  ;;  %v599_v2 = vld [vmem:[#allocation2 + $0x68] sm:$0xff]  ;;  %v598_v3 = vld [vmem:[#allocation2 + $0x60] sm:$0xff]  ;;  %v597_v4 = vld [vmem:[#allocation2 + $0x58] sm:$0xff]  ;;  %vm901_vm5 = vcmask 64512   ;;  %s2110_s14 = sld [smem:[#allocation29_spill]] }
  0x3a   : > { %s574_s13 = scalar_select %p573_p0, %s1693_s28, 1  ;;  %v596_v5 = vld [vmem:[#allocation2 + $0x50] sm:$0xff]  ;;  %v595_v8 = vld [vmem:[#allocation2 + $0x48] sm:$0xff]  ;;  %v594_v9 = vld [vmem:[#allocation2 + $0x40] sm:$0xff] }
  0x3b   : > { %710 = vmatpush.msra.mxu0 %v600_v1  ;;  %v593_v13 = vld [vmem:[#allocation2 + $0x38] sm:$0xff]  ;;  %v592_v14 = vld [vmem:[#allocation2 + $0x30] sm:$0xff]  ;;  %v591_v20 = vld [vmem:[#allocation2 + $0x28] sm:$0xff] }
  0x3c   : > { %s1273_s20 = smul.u32 48, %s574_s13  ;;  %v590_v21 = vld [vmem:[#allocation2 + $0x20] sm:$0xff]  ;;  %v589_v27 = vld [vmem:[#allocation2 + $0x18] sm:$0xff]  ;;  %v588_v28 = vld [vmem:[#allocation2 + $0x10] sm:$0xff] }
  0x3d   : > { %711 = vmatpush.msra.mxu0 %v599_v2  ;;  %v587_v33 = vld [vmem:[#allocation2 + $0x8] sm:$0xff]  ;;  %v586_v34 = vld [vmem:[#allocation2] sm:$0xff]  ;;  %v617_v40 = vld [vmem:[#allocation5 + $0x78] sm:$0xff] }
  0x3e   : > { %s583_s24 = scalar_lea.vmem %s2068_s0, %s1273_s20  ;;  %v616_v41 = vld [vmem:[#allocation5 + $0x70] sm:$0xff]  ;;  %776 = vmatpush.msra.mxu2 %v617_v40  ;;  %v615_v42 = vld [vmem:[#allocation5 + $0x68] sm:$0xff]  ;;  %v614_v43 = vld [vmem:[#allocation5 + $0x60] sm:$0xff]  ;;  %s569_s20 = sand.u32 1, %s1685_s26  }
  0x3f   : > { %712 = vmatpush.msra.mxu0 %v598_v3  ;;  %v663_v6 = vld [vmem:[%s583_s24] sm:$0xff]  ;;  %v1249_v7 = vld [vmem:[%s583_s24 + $0x10] sm:$0xff]  ;;  %v664_v18 = vld [vmem:[%s583_s24 + $0x8] sm:$0xff]  ;;  %s1272_s22 = smul.u32 48, %s569_s20  ;;  %s1067_s2 = scalar_lea.sflag [#allocation4], %s569_s20 }
  0x40   : > { %v1907_v10 = vmul.f32 255.0, %v663_v6  ;;  %v1909_v11 = vmul.f32 255.0, %v1249_v7  ;;  %v1251_v12 = vld [vmem:[%s583_s24 + $0x20] sm:$0xff]  ;;  %v1250_v19 = vld [vmem:[%s583_s24 + $0x18] sm:$0xff]  ;;  %v1916_v24 = vmul.f32 255.0, %v664_v18  ;;  %v1252_v26 = vld [vmem:[%s583_s24 + $0x28] sm:$0xff]  ;;  %777 = vmatpush.msra.mxu2 %v616_v41 }
  0x41   : > { %713 = vmatpush.msra.mxu0 %v597_v4  ;;  %v1911_v15 = vmul.f32 255.0, %v1251_v12  ;;  %v1918_v25 = vmul.f32 255.0, %v1250_v19  ;;  %v1920_v30 = vmul.f32 255.0, %v1252_v26  ;;  %v613_v44 = vld [vmem:[#allocation5 + $0x58] sm:$0xff]  ;;  %v612_v45 = vld [vmem:[#allocation5 + $0x50] sm:$0xff]  ;;  %v611_v46 = vld [vmem:[#allocation5 + $0x48] sm:$0xff] }
  0x42   : > { %v677_v16 = vmul.f32 0.299, %v1907_v10  ;;  %v679_v17 = vmul.f32 0.587, %v1909_v11  ;;  %v678_v31 = vmul.f32 0.299, %v1916_v24  ;;  %778 = vmatpush.msra.mxu2 %v615_v42 }
  0x43   : > { %714 = vmatpush.msra.mxu0 %v596_v5  ;;  %v683_v23 = vmul.f32 0.114, %v1911_v15  ;;  %v680_v32 = vmul.f32 0.587, %v1918_v25  ;;  %v684_v37 = vmul.f32 0.114, %v1920_v30 }
  0x44   : > { %v681_v22 = vadd.f32 %v679_v17, %v677_v16  ;;  %779 = vmatpush.msra.mxu2 %v614_v43  ;;  %v610_v48 = vld [vmem:[#allocation5 + $0x40] sm:$0xff]  ;;  %v609_v49 = vld [vmem:[#allocation5 + $0x38] sm:$0xff]  ;;  %v608_v50 = vld [vmem:[#allocation5 + $0x30] sm:$0xff]  ;;  %v695_v19 = vmul.f32 0.5, %v1911_v15  ;;  %v690_v26 = vmul.f32 -0.168736, %v1916_v24 }
  0x45   : > { %715 = vmatpush.msra.mxu0 %v595_v8  ;;  %v682_v36 = vadd.f32 %v680_v32, %v678_v31  ;;  %v607_v51 = vld [vmem:[#allocation5 + $0x28] sm:$0xff]  ;;  %v606_v53 = vld [vmem:[#allocation5 + $0x20] sm:$0xff]  ;;  %v605_v56 = vld [vmem:[#allocation5 + $0x18] sm:$0xff]  ;;  %s2021_s17 = scalar_lea.vmem [#allocation13], %s1272_s22  ;;  %s1306_s24 = smul.u32 48, %s1693_s28 }
  0x46   : > { %v685_v29 = vadd.f32 %v683_v23, %v681_v22  ;;  %780 = vmatpush.msra.mxu2 %v613_v44  ;;  %v618_v54 = vld [vmem:[#allocation7] sm:$0xff]  ;;  %v619_v55 = vld [vmem:[#allocation7 + $0x8] sm:$0xff]  ;;  %v604_v58 = vld [vmem:[#allocation5 + $0x10] sm:$0xff]  ;;  %s1082_s30 = sshll.u32 %s2021_s17, 4  ;;  %s1627_s18 = scalar_lea.hbm %s2110_s14, 96  ;;  %s1083_s30 = int_to_ptr.vmem [resolvable:$true] %s1082_s30 }
  0x47   : > { %716 = vmatpush.msra.mxu0 %v594_v9  ;;  %v686_v38 = vadd.f32 %v684_v37, %v682_v36  ;;  %v637_v57 = vld [vmem:[#allocation8 + $0x78] sm:$0xff]  ;;  %v636_v59 = vld [vmem:[#allocation8 + $0x70] sm:$0xff]  ;;  %v635_v61 = vld [vmem:[#allocation8 + $0x68] sm:$0xff]  ;;  %s1081_s25 = scalar_lea.hbm %s2110_s14, %s1306_s24 }
  0x48   : > { %v1253_v35 = vadd.f32 -128.0, %v685_v29  ;;  %781 = vmatpush.msra.mxu2 %v612_v45  ;;  %v603_v60 = vld [vmem:[#allocation5 + $0x8] sm:$0xff]  ;;  %v602_v62 = vld [vmem:[#allocation5] sm:$0xff]  ;;  %v634_v63 = vld [vmem:[#allocation8 + $0x60] sm:$0xff]  ;;  %s1084_s28 = sshll.u32 %s1081_s25, 4  ;;  %s1085_s28 = int_to_ptr.hbm [resolvable:$true] %s1084_s28 }
  0x49   : > { %717 = vmatpush.msra.mxu0 %v593_v13  ;;  %v1254_v39 = vadd.f32 -128.0, %v686_v38  ;;  %v633_v0 = vld [vmem:[#allocation8 + $0x58] sm:$0xff]  ;;  %v632_v1 = vld [vmem:[#allocation8 + $0x50] sm:$0xff]  ;;  %v631_v2 = vld [vmem:[#allocation8 + $0x48] sm:$0xff]  ;;  %v689_v13 = vmul.f32 -0.168736, %v1907_v10 }
  0x4a   : > { %782 = vmatpush.msra.mxu2 %v611_v46  ;;  %v630_v3 = vld [vmem:[#allocation8 + $0x40] sm:$0xff]  ;;  %v629_v4 = vld [vmem:[#allocation8 + $0x38] sm:$0xff]  ;;  %v628_v5 = vld [vmem:[#allocation8 + $0x30] sm:$0xff]  ;;  %s1621_s27 = sshra.s32 %s1085_s28, 4  ;;  %s1622_s27 = int_to_ptr.hbm [resolvable:$true] %s1621_s27 }
  0x4b   : > { %718 = vmatpush.msra.mxu0 %v592_v14  ;;  %v627_v6 = vld [vmem:[#allocation8 + $0x28] sm:$0xff]  ;;  %v626_v7 = vld [vmem:[#allocation8 + $0x20] sm:$0xff]  ;;  %v625_v8 = vld [vmem:[#allocation8 + $0x18] sm:$0xff]  ;;  %v691_v14 = vmul.f32 0.331264, %v1909_v11  ;;  %s1623_s16 = scalar_lea.hbm %s1622_s27, 48  ;;  %p1628_p5 = scmp.lt.s32.totalorder %s1622_s27, %s2110_s14 }
  0x4c   : > { %783 = vmatpush.msra.mxu2 %v610_v48  ;;  %v624_v9 = vld [vmem:[#allocation8 + $0x10] sm:$0xff]  ;;  %v623_v12 = vld [vmem:[#allocation8 + $0x8] sm:$0xff]  ;;  %v622_v17 = vld [vmem:[#allocation8] sm:$0xff]  ;;  %p1624_p1 = scmp.ne.s32.totalorder %s1622_s27, %s1623_s16  ;;  %p1629_p6 = scmp.lt.s32.totalorder %s1627_s18, %s1623_s16 }
  0x4d   : > { %719 = vmatpush.msra.mxu0 %v591_v20  ;;  %v659_v16 = vld [vmem:[%s2078_s10] sm:$0xff]  ;;  %v693_v18 = vsub.f32 %v689_v13, %v691_v14  ;;  %v660_v29 = vld [vmem:[%s2078_s10 + $0x8] sm:$0xff] }
  0x4e   : > { %784 = vmatpush.msra.mxu2 %v609_v49  ;;  %v657_v49 = vld [vmem:[%s2077_s9] sm:$0xff]  ;;  %v651_v13 = vld [vmem:[%s2074_s6 + $0x68] sm:$0xff]  ;;  %p1625_p2 = pnand %p1624_p1, %p1823_p4  ;;  %p1630_p7 = por %p1629_p6, %p1628_p5 }
  0x4f   : > { %720 = vmatpush.msra.mxu0 %v590_v21  ;;  %v697_v21 = vadd.f32 %v695_v19, %v693_v18  ;;  %v650_v14 = vld [vmem:[%s2074_s6 + $0x60] sm:$0xff]  ;;  %v647_v18 = vld [vmem:[%s2074_s6 + $0x48] sm:$0xff] }
  0x50   : > { %785 = vmatpush.msra.mxu2 %v608_v50  ;;  %v646_v19 = vld [vmem:[%s2074_s6 + $0x40] sm:$0xff]  ;;  %p1626_p3 = pneg %p1625_p2 }
  0x51   : > { %721 = vmatpush.msra.mxu0 %v589_v27  ;;  %v692_v27 = vmul.f32 0.331264, %v1918_v25 }
  0x52   : > { %786 = vmatpush.msra.mxu2 %v607_v51  ;;  %p1631_p9 = pnand %p1630_p7, %p1626_p3 }
  0x53   : > { %722 = vmatpush.msra.mxu0 %v588_v28  ;;  %v694_v32 = vsub.f32 %v690_v26, %v692_v27  ;;  %v641_v26 = vld [vmem:[%s2074_s6 + $0x18] sm:$0xff]  ;;  %v640_v27 = vld [vmem:[%s2074_s6 + $0x10] sm:$0xff] }
  0x54   : > { %787 = vmatpush.msra.mxu2 %v606_v53 }
  0x55   : > { %723 = vmatpush.msra.mxu0 %v587_v33  ;;  %v696_v33 = vmul.f32 0.5, %v1920_v30 }
  0x56   : > { %788 = vmatpush.msra.mxu2 %v605_v56 }
  0x57   : > { %724 = vmatpush.msra.mxu0 %v586_v34  ;;  %v698_v37 = vadd.f32 %v696_v33, %v694_v32  ;;  %v662_v33 = vld [vmem:[%s2080_s12] sm:$0xff] }
  0x58   : > { %725 = vmatmul.f32.vlgmr.msra.gmra.mxu0 %v1253_v35  ;;  %789 = vmatpush.msra.mxu2 %v604_v58 }
  0x5a   : > { %790 = vmatpush.msra.mxu2 %v603_v60  ;;  %v701_v60 = vmul.f32 0.418688, %v1909_v11  ;;  %v620_v11 = vld [vmem:[%s2072_s4] sm:$0xff] }
  0x5c   : > { %791 = vmatpush.msra.mxu2 %v602_v62 }
  0x5e   : > { %931 = vmatpush.msrb.mxu2 %v637_v57 }
  0x60   : > { %728 = vmatmul.f32.gmra.mxu0 %v1254_v39  ;;  %932 = vmatpush.msrb.mxu2 %v636_v59 }
  0x62   : > { %933 = vmatpush.msrb.mxu2 %v635_v61 }
  0x64   : > { %934 = vmatpush.msrb.mxu2 %v634_v63 }
  0x66   : > { %935 = vmatpush.msrb.mxu2 %v633_v0 }
  0x68   : > { %936 = vmatpush.msrb.mxu2 %v632_v1 }
  0x6a   : > { %937 = vmatpush.msrb.mxu2 %v631_v2 }
  0x6c   : > { %938 = vmatpush.msrb.mxu2 %v630_v3 }
  0x6e   : > { %939 = vmatpush.msrb.mxu2 %v629_v4 }
  0x70   : > { %940 = vmatpush.msrb.mxu2 %v628_v5 }
  0x72   : > { %941 = vmatpush.msrb.mxu2 %v627_v6 }
  0x74   : > { %942 = vmatpush.msrb.mxu2 %v626_v7 }
  0x76   : > { %943 = vmatpush.msrb.mxu2 %v625_v8 }
  0x78   : > { %944 = vmatpush.msrb.mxu2 %v624_v9 }
  0x7a   : > { %945 = vmatpush.msrb.mxu2 %v623_v12 }
  0x7c   : > { %946 = vmatpush.msrb.mxu2 %v622_v17 }
  0xd5   : > { %v726_v47 = vpop.f32.mrf.mxu0 }
  0xdd   : > { %v729_v52 = vpop.f32.mrf.mxu0 }
  0xde   : > { %753 = vmatpush.msra.mxu1 %v729_v52 }
  0xe0   : > { %754 = vmatpush.msra.mxu1 %v726_v47 }
  0xe1   : > { %1255 = vmatmul.msk.f32.vlgmr.msra.gmra.mxu1 %vm732_vm0, %v618_v54 }
  0xe2   : > { %828 = vmatpush.msrb.mxu1 %v637_v57  ;;  %v658_v57 = vld [vmem:[%s2077_s9 + $0x8] sm:$0xff] }
  0xe4   : > { %829 = vmatpush.msrb.mxu1 %v636_v59  ;;  %v699_v59 = vmul.f32 0.5, %v1907_v10 }
  0xe6   : > { %830 = vmatpush.msrb.mxu1 %v635_v61  ;;  %v703_v62 = vsub.f32 %v699_v59, %v701_v60 }
  0xe8   : > { %831 = vmatpush.msrb.mxu1 %v634_v63  ;;  %v705_v63 = vmul.f32 0.081312, %v1911_v15 }
  0xe9   : > { %1256 = vmatmul.msk.f32.gmra.mxu1 %vm732_vm0, %v619_v55 }
  0xea   : > { %832 = vmatpush.msrb.mxu1 %v633_v0  ;;  %v707_v0 = vsub.f32 %v703_v62, %v705_v63  ;;  %v655_v63 = vld [vmem:[%s2076_s8] sm:$0xff] }
  0xec   : > { %833 = vmatpush.msrb.mxu1 %v632_v1  ;;  %v700_v1 = vmul.f32 0.5, %v1916_v24 }
  0xee   : > { %834 = vmatpush.msrb.mxu1 %v631_v2  ;;  %v702_v2 = vmul.f32 0.418688, %v1918_v25  ;;  %v621_v25 = vld [vmem:[%s2072_s4 + $0x8] sm:$0xff] }
  0xf0   : > { %835 = vmatpush.msrb.mxu1 %v630_v3  ;;  %v704_v3 = vsub.f32 %v700_v1, %v702_v2  ;;  %v656_v1 = vld [vmem:[%s2076_s8 + $0x8] sm:$0xff] }
  0xf2   : > { %836 = vmatpush.msrb.mxu1 %v629_v4  ;;  %v706_v4 = vmul.f32 0.081312, %v1920_v30 }
  0xf4   : > { %837 = vmatpush.msrb.mxu1 %v628_v5  ;;  %v708_v5 = vsub.f32 %v704_v3, %v706_v4 }
  0xf6   : > { %838 = vmatpush.msrb.mxu1 %v627_v6 }
  0xf8   : > { %839 = vmatpush.msrb.mxu1 %v626_v7 }
  0xfa   : > { %840 = vmatpush.msrb.mxu1 %v625_v8  ;;  %v654_v8 = vld [vmem:[#allocation10] sm:$0xff] }
  0xfc   : > { %841 = vmatpush.msrb.mxu1 %v624_v9  ;;  %v653_v9 = vld [vmem:[%s2074_s6 + $0x78] sm:$0xff] }
  0xfd   : > { %981 = vmatpush.msrb.mxu0 %v653_v9 }
  0xfe   : > { %842 = vmatpush.msrb.mxu1 %v623_v12  ;;  %v652_v12 = vld [vmem:[%s2074_s6 + $0x70] sm:$0xff] }
  0xff   : > { %982 = vmatpush.msrb.mxu0 %v652_v12 }
 0x100   : > { %843 = vmatpush.msrb.mxu1 %v622_v17  ;;  %v648_v17 = vld [vmem:[%s2074_s6 + $0x50] sm:$0xff] }
 0x101   : > { %844 = vmatmul.f32.vlgmr.msrb.gmra.mxu1 %v697_v21  ;;  %983 = vmatpush.msrb.mxu0 %v651_v13  ;;  %v644_v21 = vld [vmem:[%s2074_s6 + $0x30] sm:$0xff] }
 0x103   : > { %984 = vmatpush.msrb.mxu0 %v650_v14 }
 0x109   : > { %847 = vmatmul.f32.gmra.mxu1 %v698_v37 }
 0x15e   : > { %v756_v20 = vpop.f32.mrf.mxu1 }
 0x15f   : > { %v762_v22 = vmul.f32 %v756_v20, %v659_v16  ;;  %v649_v16 = vld [vmem:[%s2074_s6 + $0x58] sm:$0xff] }
 0x160   : > { %985 = vmatpush.msrb.mxu0 %v649_v16  ;;  %v645_v20 = vld [vmem:[%s2074_s6 + $0x38] sm:$0xff] }
 0x161   : > { %v1276_v23 = vcvt.f32.s32 %v762_v22  ;;  %v1274_v31 = vand.u32 2147483647, %v762_v22  ;;  %v1279_v35 = vand.u32 2147483648, %v762_v22 }
 0x162   : > { %986 = vmatpush.msrb.mxu0 %v648_v17 }
 0x163   : > { %v1277_v28 = vcvt.s32.f32 %v1276_v23  ;;  %vm1275_vm1 = vcmp.lt.f32.partialorder %v1274_v31, 8388608.0  ;;  %v642_v23 = vld [vmem:[%s2074_s6 + $0x20] sm:$0xff] }
 0x164   : > { %987 = vmatpush.msrb.mxu0 %v647_v18 }
 0x165   : > { %v1278_v34 = vand.u32 2147483647, %v1277_v28  ;;  %v639_v28 = vld [vmem:[%s2074_s6 + $0x8] sm:$0xff] }
 0x166   : > { %v759_v36 = vpop.f32.mrf.mxu1  ;;  %988 = vmatpush.msrb.mxu0 %v646_v19 }
 0x167   : > { %v763_v38 = vmul.f32 %v759_v36, %v660_v29  ;;  %v1280_v39 = vor.u32 %v1279_v35, %v1278_v34  ;;  %v638_v29 = vld [vmem:[%s2074_s6] sm:$0xff] }
 0x168   : > { %989 = vmatpush.msrb.mxu0 %v645_v20 }
 0x169   : > { %v1281_v40 = vsel %vm1275_vm1, %v1280_v39, %v762_v22  ;;  %v1284_v41 = vcvt.f32.s32 %v763_v38  ;;  %v1282_v45 = vand.u32 2147483647, %v763_v38  ;;  %v1287_v47 = vand.u32 2147483648, %v763_v38 }
 0x16a   : > { %v766_v42 = vsub.f32 %v762_v22, %v1281_v40  ;;  %990 = vmatpush.msrb.mxu0 %v644_v21  ;;  %v643_v22 = vld [vmem:[%s2074_s6 + $0x28] sm:$0xff] }
 0x16b   : > { %v1285_v43 = vcvt.s32.f32 %v1284_v41  ;;  %vm1283_vm2 = vcmp.lt.f32.partialorder %v1282_v45, 8388608.0 }
 0x16c   : > { %v768_v44 = vmul.f32 %v766_v42, %v766_v42  ;;  %991 = vmatpush.msrb.mxu0 %v643_v22 }
 0x16d   : > { %v1286_v46 = vand.u32 2147483647, %v1285_v43 }
 0x16e   : > { %v770_v48 = vmul.f32 %v768_v44, %v766_v42  ;;  %992 = vmatpush.msrb.mxu0 %v642_v23 }
 0x16f   : > { %v1288_v50 = vor.u32 %v1287_v47, %v1286_v46 }
 0x170   : > { %v772_v51 = vadd.f32 %v1281_v40, %v770_v48  ;;  %993 = vmatpush.msrb.mxu0 %v641_v26 }
 0x171   : > { %v1289_v52 = vsel %vm1283_vm2, %v1288_v50, %v763_v38 }
 0x172   : > { %v774_v53 = vmul.f32 %v772_v51, %v657_v49  ;;  %v767_v54 = vsub.f32 %v763_v38, %v1289_v52  ;;  %994 = vmatpush.msrb.mxu0 %v640_v27 }
 0x174   : > { %792 = vmatmul.f32.vlgmr.msra.gmra.mxu2 %v774_v53  ;;  %v769_v55 = vmul.f32 %v767_v54, %v767_v54  ;;  %995 = vmatpush.msrb.mxu0 %v639_v28 }
 0x176   : > { %v771_v56 = vmul.f32 %v769_v55, %v767_v54  ;;  %996 = vmatpush.msrb.mxu0 %v638_v29  ;;  %v661_v54 = vld [vmem:[#allocation11] sm:$0xff] }
 0x178   : > { %v773_v58 = vadd.f32 %v1289_v52, %v771_v56 }
 0x17a   : > { %v775_v61 = vmul.f32 %v773_v58, %v658_v57 }
 0x17c   : > { %795 = vmatmul.f32.gmra.mxu2 %v775_v61 }
 0x17e   : > { %v845_v10 = vpop.f32.mrf.mxu1 }
 0x184   : > { %947 = vmatmul.f32.vlgmr.msrb.gmra.mxu2 %v707_v0 }
 0x186   : > { %v848_v15 = vpop.f32.mrf.mxu1 }
 0x18c   : > { %950 = vmatmul.f32.gmra.mxu2 %v708_v5 }
 0x1f7   : > { %v793_v6 = vpop.f32.mrf.mxu2 }
 0x1ff   : > { %v796_v7 = vpop.f32.mrf.mxu2 }
 0x200   : > { %819 = vmatpush.msra.mxu3 %v796_v7 }
 0x202   : > { %820 = vmatpush.msra.mxu3 %v793_v6 }
 0x203   : > { %1257 = vmatmul.msk.f32.vlgmr.msra.gmra.mxu3 %vm732_vm0, %v620_v11 }
 0x204   : > { %868 = vmatpush.msrb.mxu3 %v848_v15 }
 0x206   : > { %869 = vmatpush.msrb.mxu3 %v845_v10 }
 0x207   : > { %v948_v24 = vpop.f32.mrf.mxu2 }
 0x208   : > { %881 = vmatpush.msra.mxu3 %v653_v9 }
 0x20a   : > { %882 = vmatpush.msra.mxu3 %v652_v12 }
 0x20b   : > { %1258 = vmatmul.msk.f32.gmra.mxu3 %vm732_vm0, %v621_v25 }
 0x20c   : > { %883 = vmatpush.msra.mxu3 %v651_v13 }
 0x20e   : > { %884 = vmatpush.msra.mxu3 %v650_v14 }
 0x20f   : > { %v951_v30 = vpop.f32.mrf.mxu2 }
 0x210   : > { %968 = vmatpush.msra.mxu1 %v951_v30  ;;  %885 = vmatpush.msra.mxu3 %v649_v16 }
 0x212   : > { %969 = vmatpush.msra.mxu1 %v948_v24  ;;  %886 = vmatpush.msra.mxu3 %v648_v17 }
 0x213   : > { %1259 = vmatmul.msk.f32.vlgmr.msrb.gmra.mxu3 %vm732_vm0, %v654_v8  ;;  %1262 = vmatmul.msk.f32.vlgmr.msra.gmra.mxu1 %vm732_vm0, %v654_v8 }
 0x214   : > { %887 = vmatpush.msra.mxu3 %v647_v18 }
 0x216   : > { %888 = vmatpush.msra.mxu3 %v646_v19 }
 0x218   : > { %889 = vmatpush.msra.mxu3 %v645_v20 }
 0x21a   : > { %890 = vmatpush.msra.mxu3 %v644_v21 }
 0x21c   : > { %891 = vmatpush.msra.mxu3 %v643_v22 }
 0x21e   : > { %892 = vmatpush.msra.mxu3 %v642_v23 }
 0x220   : > { %893 = vmatpush.msra.mxu3 %v641_v26 }
 0x222   : > { %894 = vmatpush.msra.mxu3 %v640_v27 }
 0x224   : > { %895 = vmatpush.msra.mxu3 %v639_v28 }
 0x226   : > { %896 = vmatpush.msra.mxu3 %v638_v29 }
 0x286   : > { %v822_v31 = vpop.f32.mrf.mxu3 }
 0x287   : > { %v823_v4 = vadd.f32 128.0, %v822_v31 }
 0x28e   : > { %v825_v32 = vpop.f32.mrf.mxu3 }
 0x28f   : > { %v826_v15 = vadd.f32 128.0, %v825_v32 }
 0x290   : > { %v971_v34 = vpop.f32.mrf.mxu1 }
 0x291   : > { %v974_v35 = vmul.f32 %v971_v34, %v662_v33 }
 0x293   : > { %v1300_v36 = vcvt.f32.s32 %v974_v35  ;;  %v1298_v37 = vand.u32 2147483647, %v974_v35  ;;  %v1303_v39 = vand.u32 2147483648, %v974_v35 }
 0x295   : > { %v1301_v38 = vcvt.s32.f32 %v1300_v36  ;;  %vm1299_vm3 = vcmp.lt.f32.partialorder %v1298_v37, 8388608.0 }
 0x296   : > { %v871_v40 = vpop.f32.mrf.mxu3 }
 0x297   : > { %v874_v41 = vmul.f32 %v871_v40, %v662_v33  ;;  %v1302_v42 = vand.u32 2147483647, %v1301_v38 }
 0x299   : > { %v1292_v43 = vcvt.f32.s32 %v874_v41  ;;  %v1304_v44 = vor.u32 %v1303_v39, %v1302_v42  ;;  %v1290_v47 = vand.u32 2147483647, %v874_v41  ;;  %v1295_v50 = vand.u32 2147483648, %v874_v41 }
 0x29b   : > { %v1293_v45 = vcvt.s32.f32 %v1292_v43  ;;  %v1305_v46 = vsel %vm1299_vm3, %v1304_v44, %v974_v35  ;;  %vm1291_vm4 = vcmp.lt.f32.partialorder %v1290_v47, 8388608.0 }
 0x29c   : > { %v976_v48 = vsub.f32 %v974_v35, %v1305_v46 }
 0x29d   : > { %v1294_v49 = vand.u32 2147483647, %v1293_v45 }
 0x29e   : > { %v977_v51 = vmul.f32 %v976_v48, %v976_v48 }
 0x29f   : > { %v1296_v52 = vor.u32 %v1295_v50, %v1294_v49 }
 0x2a0   : > { %v978_v53 = vmul.f32 %v977_v51, %v976_v48 }
 0x2a1   : > { %v1297_v55 = vsel %vm1291_vm4, %v1296_v52, %v874_v41 }
 0x2a2   : > { %v876_v56 = vsub.f32 %v874_v41, %v1297_v55  ;;  %v979_v57 = vadd.f32 %v1305_v46, %v978_v53 }
 0x2a4   : > { %v877_v58 = vmul.f32 %v876_v56, %v876_v56  ;;  %v980_v59 = vmul.f32 %v979_v57, %v661_v54 }
 0x2a6   : > { %v878_v60 = vmul.f32 %v877_v58, %v876_v56  ;;  %997 = vmatmul.f32.vlgmr.msrb.gmra.mxu0 %v980_v59 }
 0x2a8   : > { %v879_v61 = vadd.f32 %v1297_v55, %v878_v60 }
 0x2aa   : > { %v880_v62 = vmul.f32 %v879_v61, %v661_v54 }
 0x2ac   : > { %897 = vmatmul.f32.vlgmr.msra.gmra.mxu3 %v880_v62 }
 0x323   : > { %v998_v0 = vpop.f32.mrf.mxu0 }
 0x324   : > { %1016 = vmatpush.msrb.mxu1 %v998_v0 }
 0x325   : > { %1263 = vmatmul.msk.f32.vlgmr.msrb.gmra.mxu1 %vm901_vm5, %v655_v63 }
 0x32d   : > { %1264 = vmatmul.msk.f32.gmra.mxu1 %vm901_vm5, %v656_v1 }
 0x32f   : > { %v898_v2 = vpop.f32.mrf.mxu3 }
 0x330   : > { %923 = vmatpush.msrb.mxu3 %v898_v2 }
 0x331   : > { %1260 = vmatmul.msk.f32.vlgmr.msrb.gmra.mxu3 %vm901_vm5, %v655_v63 }
 0x339   : > { %1261 = vmatmul.msk.f32.gmra.mxu3 %vm901_vm5, %v656_v1 }
 0x3a2   : > { %v1018_v3 = vpop.f32.mrf.mxu1 }
 0x3a3   : > { %v1024_v5 = vmul.f32 1.402, %v1018_v3  ;;  %v1040_v13 = vmul.f32 0.714136, %v1018_v3 }
 0x3a5   : > { %v1026_v6 = vadd.f32 %v1024_v5, %v823_v4 }
 0x3a7   : > { %v1028_v10 = vmax.f32 %v1026_v6, 0.0 }
 0x3a9   : > { %v1030_v7 = vmin.f32 %v1028_v10, 255.0 }
 0x3aa   : > { %v1021_v11 = vpop.f32.mrf.mxu1 }
 0x3ab   : > { %v1032_v24 = vmul.f32 0.003921569, %v1030_v7  ;;  %v1025_v25 = vmul.f32 1.402, %v1021_v11  ;;  %v1041_v26 = vmul.f32 0.714136, %v1021_v11 }
 0x3ad   : > { %1034 = vst [vmem:[%s2021_s17] sm:$0xff] %v1032_v24  ;;  %v1027_v30 = vadd.f32 %v1025_v25, %v826_v15 }
 0x3af   : > { %v1029_v8 = vmax.f32 %v1027_v30, 0.0 }
 0x3b1   : > { %v1031_v9 = vmin.f32 %v1029_v8, 255.0 }
 0x3b3   : > { %v1033_v12 = vmul.f32 0.003921569, %v1031_v9 }
 0x3b4   : > { %v925_v14 = vpop.f32.mrf.mxu3 }
 0x3b5   : > { %1035 = vst [vmem:[%s2021_s17 + $0x8] sm:$0xff] %v1033_v12  ;;  %v1036_v16 = vmul.f32 0.344136, %v925_v14  ;;  %v1053_v17 = vmul.f32 1.772, %v925_v14 }
 0x3b7   : > { %v1038_v18 = vsub.f32 %v823_v4, %v1036_v16  ;;  %v1055_v19 = vadd.f32 %v1053_v17, %v823_v4 }
 0x3b9   : > { %v1042_v20 = vsub.f32 %v1038_v18, %v1040_v13  ;;  %v1057_v21 = vmax.f32 %v1055_v19, 0.0 }
 0x3bb   : > { %v1044_v22 = vmax.f32 %v1042_v20, 0.0  ;;  %v1059_v23 = vmin.f32 %v1057_v21, 255.0 }
 0x3bc   : > { %v928_v27 = vpop.f32.mrf.mxu3 }
 0x3bd   : > { %v1046_v28 = vmin.f32 %v1044_v22, 255.0  ;;  %v1061_v29 = vmul.f32 0.003921569, %v1059_v23  ;;  %v1037_v31 = vmul.f32 0.344136, %v928_v27 }
 0x3be   : > { %v1054_v32 = vmul.f32 1.772, %v928_v27 }
 0x3bf   : > { %v1048_v33 = vmul.f32 0.003921569, %v1046_v28  ;;  %1267 = vst [vmem:[%s2021_s17 + $0x20] sm:$0xff] %v1061_v29  ;;  %v1039_v34 = vsub.f32 %v826_v15, %v1037_v31 }
 0x3c0   : > { %v1056_v35 = vadd.f32 %v1054_v32, %v826_v15 }
 0x3c1   : > { %1265 = vst [vmem:[%s2021_s17 + $0x10] sm:$0xff] %v1048_v33  ;;  %v1043_v36 = vsub.f32 %v1039_v34, %v1041_v26 }
 0x3c2   : > { %v1058_v37 = vmax.f32 %v1056_v35, 0.0 }
 0x3c3   : > { %v1045_v38 = vmax.f32 %v1043_v36, 0.0 }
 0x3c4   : > { %v1060_v39 = vmin.f32 %v1058_v37, 255.0 }
 0x3c5   : > { %v1047_v40 = vmin.f32 %v1045_v38, 255.0 }
 0x3c6   : > { %v1062_v41 = vmul.f32 0.003921569, %v1060_v39 }
 0x3c7   : > { %v1049_v42 = vmul.f32 0.003921569, %v1047_v40 }
 0x3c8   : > { %1268 = vst [vmem:[%s2021_s17 + $0x28] sm:$0xff] %v1062_v41 }
 0x3c9   : > { %1266 = vst [vmem:[%s2021_s17 + $0x18] sm:$0xff] %v1049_v42 }
 0x3ca   : > { %1634 = shalt.err (!%p1631_p9)
}
 0x3cb   : > { %s1711_s20 = smov 128   ;;  %s1712_s22 = smov 8  }
 0x3cc   : > { %1331 = dma.vmem_to_hbm [thread:$0]  (%p1823_p4), %s1083_s30, 768, %s1085_s28, %s1067_s2, %s1711_s20, %s1711_s20, %s1712_s22  }
 0x3cd PF: > { %s2112_s17 = sld [smem:[#allocation22_spill]] }
 0x3ce   : > { %s2113_s24 = sld [smem:[#allocation19_spill]] }
 0x3d3   : > { %p1368_p10 = scmp.ge.s32.totalorder %s2112_s17, 2 }
 0x3d4   : > { %s1099_s19 = sand.u32 1, %s2113_s24  }
 0x3d5   : > { %p1353_p11 = pnand %p1368_p10, %p1830_p8  ;;  %s1100_s25 = scalar_lea.sflag [#allocation4], %s1099_s19 }
 0x3d7   : > { %p1354_p12 = pneg %p1353_p11 }
 0x3d9   : > { %1676 = dma.done.wait (%p1354_p12), %s1100_s25, 768  }
 0x3da   : > { %1678 = vsyncadd (%p1354_p12), %s1100_s25, 4294966528  ;;  %s30_s30 = sadd.s32 1, %s2112_s17   ;;  %s2115_s27 = sld [smem:[#allocation20_spill]] }
 0x3db   : > { %p27_p13 = scmp.ge.s32.totalorder %s30_s30, 4   ;;  %s2116_s16 = sld [smem:[#allocation26_spill]] }
 0x3dc   : > { %s2117_s28 = sld [smem:[#allocation21_spill]]  ;;  %s2119_s25 = smov %s1685_s26 }
 0x3dd   : > { %s2118_s29 = sld [smem:[#allocation23_spill]]  ;;  %29 = sbr.rel (!%p27_p13) target bundleno = 12 (0xc), region = 136 }
 0x3e0   : > { %s2120_s26 = smov %s2115_s27 }
 0x3e1   : > { %s2121_s27 = smov %s2116_s16 }
 0x3e2   :  { %1106 = vsyncpa [#allocation3], 1 }
 0x3e3   :  { %1108 = vsyncpa [#allocation3 + $0x1], 1 }
 0x3e4   :  { %1109 = vsyncpa [#allocation6], 1 }
 0x3e5   :  { %1110 = vsyncpa [#allocation9], 1 }
 0x3e6   :  { %1111 = vsyncpa [#allocation12], 1 }
 0x3e7   :  { %1112 = vsyncpa [#allocation4], 1 }
 0x3e8   :  { %1114 = vsyncpa [#allocation4 + $0x1], 1 }

</bundles_post_ra>
